<compile_context>
chip_gen: v7x
topology: tpu7x:2x2x1
jax: 0.10.0
libtpu: 0.0.40
codegen_flags: <defaults>
</compile_context>

<pallas_src>
import functools

import numpy as np
import jax
import jax.numpy as jnp
from jax.experimental import pallas as pl
from jax.experimental.pallas import tpu as pltpu


# ---------------------------------------------------------------------------
# Kernel: one batch tile per grid step.  All feature dims are tiny and kept
# on the sublane axis; the batch tile is lane-dense (multiple of 128).
# ---------------------------------------------------------------------------
def sqj_kernel(x_ref, w1_ref, b1_ref, w2_ref, b2_ref, w3_ref, b3_ref,
               out_ref, *, in_features):
    x = x_ref[...]                     # (IN, TB)   lane-dense batch tile
    w1 = w1_ref[...]                   # (H1, IN)   input-norm already folded in

    # Layer 1: K = in_features (4) is tiny -> broadcast FMAs on the VPU
    # instead of a heavily padded MXU matmul.
    acc = w1[:, 0:1] * x[0:1, :]
    for i in range(1, in_features):
        acc = acc + w1[:, i:i + 1] * x[i:i + 1, :]
    h1 = jnp.maximum(acc + b1_ref[...], 0.0)                    # (H1, TB)

    # Layer 2: the only MXU-worthy matmul (32x32 @ 32xTB).
    h2 = jnp.dot(w2_ref[...], h1,
                 preferred_element_type=jnp.float32) + b2_ref[...]
    h2 = jnp.maximum(h2, 0.0)                                   # (H2, TB)

    # Layer 3: (1,H2)@(H2,TB) -> lane-dense (1,TB); un-norm folded into w3/b3.
    y = jnp.dot(w3_ref[...], h2,
                preferred_element_type=jnp.float32) + b3_ref[...]
    out_ref[...] = y                                            # (1, TB)


# ---------------------------------------------------------------------------
# Wrapper: fold normalization, transpose/pad the batch, build the grid.
# Weights are stored in torch convention (out_features, in_features).
# ---------------------------------------------------------------------------
def sqj_forward(x, params, *, tb=16384):
    x = jnp.asarray(x, jnp.float32)
    B, IN = x.shape

    w1, b1 = params["w1"], params["b1"]       # (H1, IN), (H1,)
    w2, b2 = params["w2"], params["b2"]       # (H2, H1), (H2,)
    w3, b3 = params["w3"], params["b3"]       # (1,  H2), (1,)

    # Fold input normalization into layer 1 and output un-normalization into
    # layer 3 (pure parameter prep; removes lane-sparse VPU work per tile).
    inv_std = 1.0 / params["in_std"]                                 # (IN,)
    w1f = w1 * inv_std[None, :]                                      # (H1, IN)
    b1f = b1 - w1 @ (params["in_mean"] * inv_std)                    # (H1,)
    w3f = w3 * params["out_std"]                                     # (1, H2)
    b3f = b3 * params["out_std"] + params["out_mean"]                # (1,)

    # Batch tile: lane-dense multiple of 128; pad B up to a tile multiple.
    tb = int(min(int(tb), max(128, pl.cdiv(B, 128) * 128)))
    b_pad = pl.cdiv(B, tb) * tb
    grid = (b_pad // tb,)

    # Transposed, zero-padded input (IN, B_pad): layout plumbing in the wrapper.
    xt = jnp.zeros((IN, b_pad), jnp.float32).at[:, :B].set(x.T)

    b1c = b1f[:, None]                                               # (H1, 1)
    b2c = b2[:, None]                                                # (H2, 1)
    b3c = b3f[:, None]                                               # (1, 1)

    # Small weights/biases: full-array blocks with constant index maps so they
    # are fetched once and stay resident in VMEM across the whole batch grid.
    def resident(a):
        return pl.BlockSpec(a.shape, lambda i: (0, 0))

    out = pl.pallas_call(
        functools.partial(sqj_kernel, in_features=IN),
        out_shape=jax.ShapeDtypeStruct((1, b_pad), jnp.float32),
        grid=grid,
        in_specs=[
            pl.BlockSpec((IN, tb), lambda i: (0, i)),   # x tile, pipelined
            resident(w1f), resident(b1c),
            resident(w2), resident(b2c),
            resident(w3f), resident(b3c),
        ],
        out_specs=pl.BlockSpec((1, tb), lambda i: (0, i)),
        compiler_params=pltpu.CompilerParams(
            dimension_semantics=("parallel",)),
    )(xt, w1f, b1c, w2, b2c, w3f, b3c)

    return out[:, :B].T                                               # (B, 1)


# ---------------------------------------------------------------------------
# Deterministic parameter initialization (mirrors Linear.reset_parameters:
# orthogonal weights, uniform(-1/sqrt(out), 1/sqrt(out)) bias).
# ---------------------------------------------------------------------------
def _orthogonal(key, out_f, in_f):
    a = jax.random.normal(key, (max(out_f, in_f), min(out_f, in_f)), jnp.float32)
    q, r = jnp.linalg.qr(a)
    q = q * jnp.sign(jnp.diagonal(r))[None, :]
    if out_f < in_f:
        q = q.T
    return q[:out_f, :in_f]                   # (out_features, in_features)


def _linear_params(key, in_f, out_f):
    kw, kb = jax.random.split(key)
    w = _orthogonal(kw, out_f, in_f).astype(jnp.float32)     # torch (out, in)
    bound = 1.0 / np.sqrt(out_f)              # weight.size(0) == out_features
    b = jax.random.uniform(kb, (out_f,), jnp.float32, -bound, bound)
    return w, b


def make_params(key, input_size, hidden):
    k1, k2, k3 = jax.random.split(key, 3)
    w1, b1 = _linear_params(k1, input_size, hidden[0])
    w2, b2 = _linear_params(k2, hidden[0], hidden[1])
    w3, b3 = _linear_params(k3, hidden[1], 1)
    return {
        "w1": w1, "b1": b1,
        "w2": w2, "b2": b2,
        "w3": w3, "b3": b3,
        # normalization buffers (non-trainable Parameters in torch)
        "in_mean": jnp.zeros((input_size,), jnp.float32),
        "in_std": jnp.ones((input_size,), jnp.float32),
        "out_mean": jnp.zeros((1,), jnp.float32),
        "out_std": jnp.ones((1,), jnp.float32),
    }


def reference_forward(x, p):
    """Pure-JAX reference of sqJModel.forward for validation."""
    xn = (x - p["in_mean"]) / p["in_std"]
    h1 = jnp.maximum(xn @ p["w1"].T + p["b1"], 0.0)
    h2 = jnp.maximum(h1 @ p["w2"].T + p["b2"], 0.0)
    y = h2 @ p["w3"].T + p["b3"]
    return y * p["out_std"] + p["out_mean"]


if __name__ == "__main__":
    key = jax.random.PRNGKey(0)
    k_x, k_p, k_stats = jax.random.split(key, 3)

    batch, input_size, hidden = 300, 4, [32, 32]   # non-multiple of 128 -> exercises padding

    params = make_params(k_p, input_size, hidden)
    # give the normalization buffers non-trivial values to exercise the path
    k_m, k_s, k_om, k_os = jax.random.split(k_stats, 4)
    params["in_mean"] = jax.random.normal(k_m, (input_size,), jnp.float32)
    params["in_std"] = 0.5 + jax.random.uniform(k_s, (input_size,), jnp.float32)
    params["out_mean"] = jax.random.normal(k_om, (1,), jnp.float32)
    params["out_std"] = 0.5 + jax.random.uniform(k_os, (1,), jnp.float32)

    x = jax.random.normal(k_x, (batch, input_size), jnp.float32)

    ref = jax.block_until_ready(reference_forward(x, params))

    # small tile -> several grid steps plus padding path
    out_small = jax.block_until_ready(sqj_forward(x, params, tb=128))
    # default (large) tile -> single-step path
    out_big = jax.block_until_ready(sqj_forward(x, params))

    assert out_small.shape == (batch, 1) and out_big.shape == (batch, 1)
    np.testing.assert_allclose(np.asarray(out_small), np.asarray(ref),
                               rtol=1e-4, atol=1e-4)
    np.testing.assert_allclose(np.asarray(out_big), np.asarray(ref),
                               rtol=1e-4, atol=1e-4)
    print("KERNEL_OK")
</pallas_src>

<mosaic_0001>
module attributes {stable_mosaic.version = 11 : i64} {
  func.func @sqj_kernel(%arg0: i32, %arg1: memref<4x128xf32, #tpu.memory_space<vmem>>, %arg2: memref<32x4xf32, #tpu.memory_space<vmem>>, %arg3: memref<32x1xf32, #tpu.memory_space<vmem>>, %arg4: memref<32x32xf32, #tpu.memory_space<vmem>>, %arg5: memref<32x1xf32, #tpu.memory_space<vmem>>, %arg6: memref<1x32xf32, #tpu.memory_space<vmem>>, %arg7: memref<1x1xf32, #tpu.memory_space<vmem>>, %arg8: memref<1x128xf32, #tpu.memory_space<vmem>>) attributes {dimension_semantics = [#tpu.dimension_semantics<parallel>], iteration_bounds = array<i64: 3>, scalar_prefetch = 0 : i64, scratch_operands = 0 : i64, tpu.core_type = #tpu.core_type<tc>, window_params = [{transform_indices = @transform_0, window_bounds = array<i64: 4, 128>}, {pipeline_mode = #tpu.pipeline_mode<synchronous>, transform_indices = @transform_1, window_bounds = array<i64: 32, 4>}, {pipeline_mode = #tpu.pipeline_mode<synchronous>, transform_indices = @transform_2, window_bounds = array<i64: 32, 1>}, {pipeline_mode = #tpu.pipeline_mode<synchronous>, transform_indices = @transform_3, window_bounds = array<i64: 32, 32>}, {pipeline_mode = #tpu.pipeline_mode<synchronous>, transform_indices = @transform_4, window_bounds = array<i64: 32, 1>}, {pipeline_mode = #tpu.pipeline_mode<synchronous>, transform_indices = @transform_5, window_bounds = array<i64: 1, 32>}, {pipeline_mode = #tpu.pipeline_mode<synchronous>, transform_indices = @transform_6, window_bounds = array<i64: 1, 1>}, {transform_indices = @transform_7, window_bounds = array<i64: 1, 128>}]} {
    %c0 = arith.constant 0 : index
    %c0_0 = arith.constant 0 : index
    %0 = vector.load %arg1[%c0, %c0_0] : memref<4x128xf32, #tpu.memory_space<vmem>>, vector<4x128xf32>
    %c0_1 = arith.constant 0 : index
    %c0_2 = arith.constant 0 : index
    %1 = vector.load %arg2[%c0_1, %c0_2] : memref<32x4xf32, #tpu.memory_space<vmem>>, vector<32x4xf32>
    %2 = vector.extract_strided_slice %1 {offsets = [0, 0], sizes = [32, 1], strides = [1, 1]} : vector<32x4xf32> to vector<32x1xf32>
    %3 = vector.extract_strided_slice %0 {offsets = [0, 0], sizes = [1, 128], strides = [1, 1]} : vector<4x128xf32> to vector<1x128xf32>
    %4 = vector.broadcast %2 : vector<32x1xf32> to vector<32x128xf32>
    %5 = vector.broadcast %3 : vector<1x128xf32> to vector<32x128xf32>
    %6 = arith.mulf %4, %5 : vector<32x128xf32>
    %7 = vector.extract_strided_slice %1 {offsets = [0, 1], sizes = [32, 1], strides = [1, 1]} : vector<32x4xf32> to vector<32x1xf32>
    %8 = vector.extract_strided_slice %0 {offsets = [1, 0], sizes = [1, 128], strides = [1, 1]} : vector<4x128xf32> to vector<1x128xf32>
    %9 = vector.broadcast %7 : vector<32x1xf32> to vector<32x128xf32>
    %10 = vector.broadcast %8 : vector<1x128xf32> to vector<32x128xf32>
    %11 = arith.mulf %9, %10 : vector<32x128xf32>
    %12 = arith.addf %6, %11 : vector<32x128xf32>
    %13 = vector.extract_strided_slice %1 {offsets = [0, 2], sizes = [32, 1], strides = [1, 1]} : vector<32x4xf32> to vector<32x1xf32>
    %14 = vector.extract_strided_slice %0 {offsets = [2, 0], sizes = [1, 128], strides = [1, 1]} : vector<4x128xf32> to vector<1x128xf32>
    %15 = vector.broadcast %13 : vector<32x1xf32> to vector<32x128xf32>
    %16 = vector.broadcast %14 : vector<1x128xf32> to vector<32x128xf32>
    %17 = arith.mulf %15, %16 : vector<32x128xf32>
    %18 = arith.addf %12, %17 : vector<32x128xf32>
    %19 = vector.extract_strided_slice %1 {offsets = [0, 3], sizes = [32, 1], strides = [1, 1]} : vector<32x4xf32> to vector<32x1xf32>
    %20 = vector.extract_strided_slice %0 {offsets = [3, 0], sizes = [1, 128], strides = [1, 1]} : vector<4x128xf32> to vector<1x128xf32>
    %21 = vector.broadcast %19 : vector<32x1xf32> to vector<32x128xf32>
    %22 = vector.broadcast %20 : vector<1x128xf32> to vector<32x128xf32>
    %23 = arith.mulf %21, %22 : vector<32x128xf32>
    %24 = arith.addf %18, %23 : vector<32x128xf32>
    %c0_3 = arith.constant 0 : index
    %c0_4 = arith.constant 0 : index
    %25 = vector.load %arg3[%c0_3, %c0_4] : memref<32x1xf32, #tpu.memory_space<vmem>>, vector<32x1xf32>
    %26 = vector.broadcast %25 : vector<32x1xf32> to vector<32x128xf32>
    %27 = arith.addf %24, %26 : vector<32x128xf32>
    %cst = arith.constant 0.000000e+00 : f32
    %28 = vector.broadcast %cst : f32 to vector<32x128xf32>
    %29 = arith.maximumf %27, %28 : vector<32x128xf32>
    %c0_5 = arith.constant 0 : index
    %c0_6 = arith.constant 0 : index
    %30 = vector.load %arg4[%c0_5, %c0_6] : memref<32x32xf32, #tpu.memory_space<vmem>>, vector<32x32xf32>
    %cst_7 = arith.constant dense<0.000000e+00> : vector<32x128xf32>
    %31 = tpu.matmul %30, %29, %cst_7 {dimension_numbers = #tpu.dot_dimension_numbers<[1], [0], [0], [1], [0, 0, 1, 1], [], []>} : vector<32x32xf32>, vector<32x128xf32>, vector<32x128xf32> -> vector<32x128xf32>
    %c0_8 = arith.constant 0 : index
    %c0_9 = arith.constant 0 : index
    %32 = vector.load %arg5[%c0_8, %c0_9] : memref<32x1xf32, #tpu.memory_space<vmem>>, vector<32x1xf32>
    %33 = vector.broadcast %32 : vector<32x1xf32> to vector<32x128xf32>
    %34 = arith.addf %31, %33 : vector<32x128xf32>
    %cst_10 = arith.constant 0.000000e+00 : f32
    %35 = vector.broadcast %cst_10 : f32 to vector<32x128xf32>
    %36 = arith.maximumf %34, %35 : vector<32x128xf32>
    %c0_11 = arith.constant 0 : index
    %c0_12 = arith.constant 0 : index
    %37 = vector.load %arg6[%c0_11, %c0_12] : memref<1x32xf32, #tpu.memory_space<vmem>>, vector<1x32xf32>
    %cst_13 = arith.constant dense<0.000000e+00> : vector<1x128xf32>
    %38 = tpu.matmul %37, %36, %cst_13 {dimension_numbers = #tpu.dot_dimension_numbers<[1], [0], [0], [1], [0, 0, 1, 1], [], []>} : vector<1x32xf32>, vector<32x128xf32>, vector<1x128xf32> -> vector<1x128xf32>
    %c0_14 = arith.constant 0 : index
    %c0_15 = arith.constant 0 : index
    %39 = vector.load %arg7[%c0_14, %c0_15] : memref<1x1xf32, #tpu.memory_space<vmem>>, vector<1x1xf32>
    %40 = vector.broadcast %39 : vector<1x1xf32> to vector<1x128xf32>
    %41 = arith.addf %38, %40 : vector<1x128xf32>
    %c0_16 = arith.constant 0 : index
    %c0_17 = arith.constant 0 : index
    %42 = vector.load %arg8[%c0_16, %c0_17] : memref<1x128xf32, #tpu.memory_space<vmem>>, vector<1x128xf32>
    tpu.vector_store %arg8[%c0_16, %c0_17], %41 {strides = array<i32>} : memref<1x128xf32, #tpu.memory_space<vmem>>, vector<1x128xf32>,
    return
  }
  func.func @transform_0(%arg0: i32) -> (i32, i32) {
    %c0_i32 = arith.constant 0 : i32
    %c0_i32_0 = arith.constant 0 : i32
    return %c0_i32, %arg0 : i32, i32
  }
  func.func @transform_1(%arg0: i32) -> (i32, i32) {
    %c0_i32 = arith.constant 0 : i32
    %c0_i32_0 = arith.constant 0 : i32
    %c0_i32_1 = arith.constant 0 : i32
    return %c0_i32, %c0_i32_0 : i32, i32
  }
  func.func @transform_2(%arg0: i32) -> (i32, i32) {
    %c0_i32 = arith.constant 0 : i32
    %c0_i32_0 = arith.constant 0 : i32
    %c0_i32_1 = arith.constant 0 : i32
    return %c0_i32, %c0_i32_0 : i32, i32
  }
  func.func @transform_3(%arg0: i32) -> (i32, i32) {
    %c0_i32 = arith.constant 0 : i32
    %c0_i32_0 = arith.constant 0 : i32
    %c0_i32_1 = arith.constant 0 : i32
    return %c0_i32, %c0_i32_0 : i32, i32
  }
  func.func @transform_4(%arg0: i32) -> (i32, i32) {
    %c0_i32 = arith.constant 0 : i32
    %c0_i32_0 = arith.constant 0 : i32
    %c0_i32_1 = arith.constant 0 : i32
    return %c0_i32, %c0_i32_0 : i32, i32
  }
  func.func @transform_5(%arg0: i32) -> (i32, i32) {
    %c0_i32 = arith.constant 0 : i32
    %c0_i32_0 = arith.constant 0 : i32
    %c0_i32_1 = arith.constant 0 : i32
    return %c0_i32, %c0_i32_0 : i32, i32
  }
  func.func @transform_6(%arg0: i32) -> (i32, i32) {
    %c0_i32 = arith.constant 0 : i32
    %c0_i32_0 = arith.constant 0 : i32
    %c0_i32_1 = arith.constant 0 : i32
    return %c0_i32, %c0_i32_0 : i32, i32
  }
  func.func @transform_7(%arg0: i32) -> (i32, i32) {
    %c0_i32 = arith.constant 0 : i32
    %c0_i32_0 = arith.constant 0 : i32
    return %c0_i32, %arg0 : i32, i32
  }
}

</mosaic_0001>

<bundles_post_ra>
// kernel: tpu_custom_call.1
= control target key start
LH: loop header
LB: loop body
LE: loop exit
PB: predicated region body
PF: predicated region fallthrough
CT: control target
= control target key end

     0   :  { %s1110_s0 = inlined_call_operand.vmem [shape: f32[4,384], index: 0, kind: input, shape index: {}]   ;;  %s1111_s1 = inlined_call_operand.vmem [shape: f32[32,4], index: 1, kind: input, shape index: {}]   ;;  %s1112_s2 = inlined_call_operand.vmem [shape: f32[32,1], index: 2, kind: input, shape index: {}]   ;;  %s1113_s3 = inlined_call_operand.vmem [shape: f32[32,32], index: 3, kind: input, shape index: {}]   ;;  %s1114_s4 = inlined_call_operand.vmem [shape: f32[32,1], index: 4, kind: input, shape index: {}]   ;;  %s1115_s5 = inlined_call_operand.vmem [shape: f32[1,32], index: 5, kind: input, shape index: {}]   ;;  %s1116_s6 = inlined_call_operand.<no memory space> [shape: f32[1,1], index: 6, kind: input, shape index: {}]   ;;  %s1117_s7 = inlined_call_operand.hbm [shape: f32[1,384], index: 7, kind: output, shape index: {}]  }
   0x1   :  { %v12_v0 = vstv %s1116_s6 }
   0x2   :  { %13 = vst [vmem:[#allocation2] sm:$0x1] %v12_v0 }
   0x3   :  { %14 = vsyncpa [#allocation4], 0 }
   0x4   :  { %16 = vsyncpa [#allocation4 + $0x1], 0  ;;  %s944_s26 = smov 0   ;;  %s946_s27 = smov 0  }
   0x5   :  { %s948_s28 = smov 0   ;;  %s950_s29 = smov 0  }
   0x6 LB: > { %s965_s6 = sadd.s32 4294967295, %s891_s29   ;;  %s707_s30 = sadd.s32 4294967294, %s891_s29   ;;  %s891_s29 = sphi %s950_s29, %s1123_s29   ;;  %s887_s28 = sphi %s948_s28, %s1122_s28   ;;  %s883_s27 = sphi %s946_s27, %s1121_s27   ;;  %s879_s26 = sphi %s944_s26, %s1120_s26  }
   0x7   : > { %s969_s8 = sadd.s32 1, %s891_s29   ;;  %s181_s9 = sadd.s32 1, %s887_s28 }
   0x8   : > { %s178_s10 = ssub.s32 %s891_s29, %s969_s8  ;;  %p191_p0 = scmp.ne.s32.totalorder %s887_s28, %s883_s27 }
   0x9   : > { %p179_p1 = scmp.eq.s32.totalorder %s178_s10, 0  ;;  %p192_p2 = scmp.eq.s32.totalorder %s965_s6, 2 }
   0xa   : > { %p197_p3 = scmp.ne.s32.totalorder %s883_s27, %s879_s26  ;;  %p198_p4 = scmp.eq.s32.totalorder %s707_s30, 2 }
   0xb   : > { %s980_s11 = scalar_select %p179_p1, %s887_s28, %s181_s9  }
   0xc   : > { %p982_p5 = por %p192_p2, %p191_p0  ;;  %p986_p6 = por %p198_p4, %p197_p3 }
   0xd   : > { %p710_p7 = scmp.ge.s32.totalorder %s891_s29, 1  ;;  %p241_p8 = scmp.lt.s32.totalorder %s891_s29, 4 }
   0xf   : > { %p242_p9 = pnand %p710_p7, %p241_p8 }
  0x10   : > { %v276_v1 = vld [vmem:[%s1111_s1] sm:$0xff] (!%p242_p9)  ;;  %v893_v2 = vmov (!%p242_p9), 3   ;;  %v894_v3 = vmov (!%p242_p9), 1   ;;  %v277_v4 = vld [vmem:[%s1111_s1 + $0x8] sm:$0xff] (!%p242_p9)  ;;  %v895_v5 = vmov (!%p242_p9), 2   ;;  %v279_v6 = vld [vmem:[%s1111_s1 + $0x18] sm:$0xff] (!%p242_p9)  ;;  %v300_v26 = vlaneseq (!%p242_p9) }
  0x11   : > { %245 = sbr.rel (%p242_p9) target bundleno = 661 (0x295), region = 48  ;;  %822 = vset.pattern.permute.xlu0 (!%p242_p9), %v893_v2  ;;  %818 = vset.pattern.permute.xlu1 (!%p242_p9), %v894_v3  ;;  %v278_v7 = vld [vmem:[%s1111_s1 + $0x10] sm:$0xff] (!%p242_p9)  ;;  %v896_v8 = vmov (!%p242_p9), 0   ;;  %v392_v9 = vld [vmem:[%s1112_s2] sm:$0xff] (!%p242_p9)  ;;  %v395_v10 = vld [vmem:[%s1112_s2 + $0x18] sm:$0xff] (!%p242_p9)  ;;  %vm452_vm0 = vcmask (!%p242_p9), 261120  }
  0x12   : > { %365 = vperm.xlu0 (!%p242_p9), %822, %v276_v1   ;;  %309 = vperm.xlu1 (!%p242_p9), %818, %v276_v1   ;;  %v429_v11 = vld [vmem:[%s1114_s4 + $0x8] sm:$0xff] (!%p242_p9)  ;;  %v431_v12 = vld [vmem:[%s1114_s4 + $0x18] sm:$0xff] (!%p242_p9)  ;;  %v394_v14 = vld [vmem:[%s1112_s2 + $0x10] sm:$0xff] (!%p242_p9)  ;;  %p271_p10 = scmp.lt.s32.totalorder (!%p242_p9), %s965_s6, 2  ;;  %v1034_v29 = vshrl.u32 (!%p242_p9), %v300_v26, 7  ;;  %vm898_vm1 = vmmov (!%p242_p9), 0  }
  0x13   : > { %v393_v13 = vld [vmem:[%s1112_s2 + $0x8] sm:$0xff] (!%p242_p9)  ;;  %v428_v15 = vld [vmem:[%s1114_s4] sm:$0xff] (!%p242_p9)  ;;  %v430_v16 = vld [vmem:[%s1114_s4 + $0x10] sm:$0xff] (!%p242_p9)  ;;  %s269_s23 = sand.u32 (!%p242_p9), 1, %s883_s27   ;;  %s717_s24 = sshll.u32 (!%p242_p9), %s965_s6, 4 }
  0x14   : > { %v424_v17 = vld [vmem:[%s1113_s3] sm:$0xff] (!%p242_p9)  ;;  %v302_v31 = vsub.s32 (!%p242_p9), 0, %v1034_v29  ;;  %v326_v32 = vsub.s32 (!%p242_p9), 1, %v1034_v29  ;;  %v354_v37 = vsub.s32 (!%p242_p9), 2, %v1034_v29  ;;  %v382_v39 = vsub.s32 (!%p242_p9), 3, %v1034_v29  ;;  %v427_v26 = vld [vmem:[%s1113_s3 + $0x18] sm:$0xff] (!%p242_p9) }
  0x15   : > { %741 = vmatprep.mubr.msk.f32.mxu0 (!%p242_p9), %vm452_vm0, %v424_v17  ;;  %v555_v18 = vld [vmem:[#allocation2] sm:$0x1] (!%p242_p9)  ;;  %s900_s16 = smov (!%p242_p9), [#allocation3]  }
  0x16   : > { %823 = vset.pattern.permute.xlu0 (!%p242_p9), %v895_v5  ;;  %313 = vperm.xlu1 (!%p242_p9), %818, %v277_v4   ;;  %s833_s17 = sshll.u32 (!%p242_p9), %s900_s16, 4  ;;  %s834_s17 = int_to_ptr.vmem [resolvable:$false] %s833_s17 }
  0x17   : > { %337 = vperm.xlu0 (!%p242_p9), %823, %v276_v1   ;;  %s835_s18 = scalar_lea.vmem (!%p242_p9), %s834_s17, 32 }
  0x18   : > { %s272_s25 = scalar_select %p271_p10, %s965_s6, 2 }
  0x19   : > { %s640_s6 = scalar_lea.sflag [#allocation4], %s269_s23 }
  0x1a   : > { %819 = vset.pattern.permute.xlu1 %v895_v5  ;;  %s711_s30 = sshll.u32 %s272_s25, 2  ;;  %s270_s25 = scalar_lea.vmem [#allocation3], %s269_s23 }
  0x1b   : > { %349 = vperm.xlu0 %823, %v279_v6   ;;  %341 = vperm.xlu1 %819, %v277_v4   ;;  %s274_s14 = scalar_lea.vmem %s1110_s0, %s711_s30  ;;  %s652_s30 = sshll.u32 %s270_s25, 4  ;;  %s1070_s30 = int_to_ptr.vmem [resolvable:$true] %s652_s30 }
  0x1c   : > { %v275_v33 = vld [vmem:[%s274_s14] sm:$0xf]  ;;  %s1068_s14 = scalar_lea.hbm %s1117_s7, %s717_s24  ;;  %s829_s15 = scalar_lea.vmem %s1070_s30, 16 }
  0x1d   : > { %v303_v35 = vrot.slane %v275_v33, %v302_v31  ;;  %v327_v38 = vrot.slane %v275_v33, %v326_v32  ;;  %v355_v41 = vrot.slane %v275_v33, %v354_v37  ;;  %v383_v45 = vrot.slane %v275_v33, %v382_v39  ;;  %p830_p11 = scmp.ne.s32.totalorder %s1070_s30, %s829_s15  ;;  %p836_p0 = scmp.lt.s32.totalorder %s1070_s30, %s834_s17 }
  0x1e   : > { %p837_p1 = scmp.lt.s32.totalorder %s835_s18, %s829_s15 }
  0x1f   : > { %826 = vset.pattern.permute.xlu0 %v896_v8  ;;  %820 = vset.pattern.permute.xlu1 %v896_v8  ;;  %p831_p12 = pnand %p830_p11, %p982_p5 }
  0x20   : > { %282 = vperm.xlu0 %826, %v276_v1   ;;  %292 = vperm.xlu1 %820, %v278_v7   ;;  %p838_p2 = por %p837_p1, %p836_p0 }
  0x21   : > { %p832_p13 = pneg %p831_p12 }
  0x23   : > { %p839_p3 = pnand %p838_p2, %p832_p13 }
  0x24   : > { %287 = vperm.xlu0 %826, %v277_v4   ;;  %821 = vset.pattern.permute.xlu1 %v894_v3 }
  0x25   : > { %317 = vperm.xlu1 %821, %v278_v7  }
  0x28   : > { %297 = vperm.xlu0 %826, %v279_v6  }
  0x29   : > { %321 = vperm.xlu1 %821, %v279_v6  }
  0x2c   : > { %398 = vperm.xlu0 %826, %v392_v9  }
  0x2d   : > { %824 = vset.pattern.permute.xlu1 %v893_v2 }
  0x2e   : > { %369 = vperm.xlu1 %824, %v277_v4  }
  0x30   : > { %413 = vperm.xlu0 %826, %v395_v10  }
  0x32   : > { %825 = vset.pattern.permute.xlu1 %v895_v5 }
  0x33   : > { %345 = vperm.xlu1 %825, %v278_v7  }
  0x34   : > { %439 = vperm.xlu0 %826, %v429_v11  }
  0x37   : > { %827 = vset.pattern.permute.xlu1 %v893_v2 }
  0x38   : > { %449 = vperm.xlu0 %826, %v431_v12   ;;  %373 = vperm.xlu1 %827, %v278_v7  }
  0x3c   : > { %377 = vperm.xlu1 %827, %v279_v6  }
  0x40   : > { %828 = vset.pattern.permute.xlu1 %v896_v8 }
  0x41   : > { %403 = vperm.xlu1 %828, %v393_v13  }
  0x45   : > { %408 = vperm.xlu1 %828, %v394_v14  }
  0x49   : > { %434 = vperm.xlu1 %828, %v428_v15  }
  0x4d   : > { %444 = vperm.xlu1 %828, %v430_v16  }
  0x51   : > { %558 = vperm.xlu1 %828, %v555_v18  }
  0x91   : > { %v310_v19 = vpop.permute.xlu1 %309  ;;  %v366_v20 = vpop.permute.xlu0 %365 }
  0x92   : > { %v328_v44 = vmul.f32 %v327_v38, %v310_v19  ;;  %v384_v53 = vmul.f32 %v383_v45, %v366_v20 }
  0x95   : > { %v314_v21 = vpop.permute.xlu1 %313 }
  0x96   : > { %v338_v22 = vpop.permute.xlu0 %337  ;;  %v329_v51 = vmul.f32 %v327_v38, %v314_v21 }
  0x97   : > { %v356_v46 = vmul.f32 %v355_v41, %v338_v22 }
  0x9a   : > { %v342_v23 = vpop.permute.xlu1 %341  ;;  %v350_v25 = vpop.permute.xlu0 %349 }
  0x9b   : > { %v359_v54 = vmul.f32 %v355_v41, %v350_v25  ;;  %v357_v59 = vmul.f32 %v355_v41, %v342_v23  ;;  %v426_v25 = vld [vmem:[%s1113_s3 + $0x10] sm:$0xff] }
  0x9f   : > { %v293_v24 = vpop.permute.xlu1 %292  ;;  %v283_v28 = vpop.permute.xlu0 %282 }
  0xa0   : > { %v304_v40 = vmul.f32 %v303_v35, %v283_v28  ;;  %v306_v62 = vmul.f32 %v303_v35, %v293_v24  ;;  %v425_v24 = vld [vmem:[%s1113_s3 + $0x8] sm:$0xff]  ;;  %v899_v28 = vmov 0.0  }
  0xa1   : > { %755 = vmatprep.mubr.msk.f32.mxu1 %vm898_vm1, %v899_v28 }
  0xa2   : > { %v332_v47 = vadd.f32 %v328_v44, %v304_v40 }
  0xa3   : > { %v288_v34 = vpop.permute.xlu0 %287 }
  0xa4   : > { %v318_v27 = vpop.permute.xlu1 %317  ;;  %v305_v48 = vmul.f32 %v303_v35, %v288_v34  ;;  %v360_v57 = vadd.f32 %v356_v46, %v332_v47 }
  0xa5   : > { %v330_v58 = vmul.f32 %v327_v38, %v318_v27  ;;  %v897_v27 = vmov 0.0|0.0  }
  0xa6   : > { %v333_v55 = vadd.f32 %v329_v51, %v305_v48  ;;  %v388_v1 = vadd.f32 %v384_v53, %v360_v57  ;;  %766 = vmatprep.subr.bf16.mxu1 %v897_v27 }
  0xa7   : > { %v298_v42 = vpop.permute.xlu0 %297  ;;  %v334_v5 = vadd.f32 %v330_v58, %v306_v62 }
  0xa8   : > { %v322_v30 = vpop.permute.xlu1 %321  ;;  %v307_v49 = vmul.f32 %v303_v35, %v298_v42  ;;  %v361_v4 = vadd.f32 %v357_v59, %v333_v55 }
  0xa9   : > { %v331_v50 = vmul.f32 %v327_v38, %v322_v30 }
  0xab   : > { %v335_v56 = vadd.f32 %v331_v50, %v307_v49  ;;  %v399_v63 = vpop.permute.xlu0 %398  ;;  %v554_v49 = vld [vmem:[%s1115_s5] sm:$0x1] }
  0xac   : > { %v416_v6 = vadd.f32 %v399_v63, %v388_v1 }
  0xad   : > { %v370_v36 = vpop.permute.xlu1 %369  ;;  %v363_v3 = vadd.f32 %v359_v54, %v335_v56 }
  0xae   : > { %v385_v60 = vmul.f32 %v383_v45, %v370_v36  ;;  %v420_v14 = vmax.f32 %v416_v6, 0.0 }
  0xaf   : > { %v414_v13 = vpop.permute.xlu0 %413 }
  0xb0   : > { %v389_v9 = vadd.f32 %v385_v60, %v361_v4 }
  0xb2   : > { %v346_v43 = vpop.permute.xlu1 %345 }
  0xb3   : > { %v358_v2 = vmul.f32 %v355_v41, %v346_v43  ;;  %v440_v30 = vpop.permute.xlu0 %439 }
  0xb5   : > { %v362_v11 = vadd.f32 %v358_v2, %v334_v5 }
  0xb7   : > { %v374_v52 = vpop.permute.xlu1 %373  ;;  %v450_v38 = vpop.permute.xlu0 %449 }
  0xb8   : > { %v386_v7 = vmul.f32 %v383_v45, %v374_v52 }
  0xba   : > { %v390_v17 = vadd.f32 %v386_v7, %v362_v11 }
  0xbb   : > { %v378_v61 = vpop.permute.xlu1 %377 }
  0xbc   : > { %v387_v0 = vmul.f32 %v383_v45, %v378_v61 }
  0xbe   : > { %v391_v8 = vadd.f32 %v387_v0, %v363_v3 }
  0xc0   : > { %v404_v10 = vpop.permute.xlu1 %403  ;;  %v419_v15 = vadd.f32 %v414_v13, %v391_v8 }
  0xc1   : > { %v417_v12 = vadd.f32 %v404_v10, %v389_v9 }
  0xc2   : > { %v423_v22 = vmax.f32 %v419_v15, 0.0 }
  0xc3   : > { %v421_v16 = vmax.f32 %v417_v12, 0.0 }
  0xc4   : > { %v409_v18 = vpop.permute.xlu1 %408 }
  0xc5   : > { %v418_v19 = vadd.f32 %v409_v18, %v390_v17  ;;  %v758_v20 = vpack.c.bf16 %v421_v16, %v420_v14 }
  0xc7   : > { %v422_v21 = vmax.f32 %v418_v19, 0.0  ;;  %759 = vmatprep.subr.bf16.mxu0 %v758_v20 }
  0xc8   : > { %761 = vmatpush3.bf16.msra.mxu0 %v758_v20  ;;  %v435_v32 = vpop.permute.xlu1 %434 }
  0xc9   : > { %v762_v23 = vpack.c.bf16 %v423_v22, %v422_v21 }
  0xcb   : > { %763 = vmatprep.subr.bf16.mxu0 %v762_v23 }
  0xcc   : > { %765 = vmatpush3.bf16.msra.mxu0 %v762_v23  ;;  %v445_v41 = vpop.permute.xlu1 %444 }
  0xcf   : > { %742 = vmatmul.mubr.msk.f32.vlgmr.msra.gmra.mrb[0].mxu0 %vm452_vm0, %v425_v24 }
  0xd0   : > { %744 = vmatprep.mubr.msk.f32.mxu0 %vm452_vm0, %v426_v25  ;;  %v559_v50 = vpop.permute.xlu1 %558 }
  0xd1   : > { %v564_v51 = vrot.slane %v559_v50, %v302_v31 }
  0xd3   : > { %745 = vmatmul.mubr.msk.f32.gmra.mrb[2].mxu0 %vm452_vm0, %v427_v26 }
 0x1a2   : > { %v743_v33 = vpop.f32.mrb[0].mxu0 }
 0x1a3   : > { %v537_v34 = vadd.f32 %v743_v33, %v440_v30  ;;  %v531_v35 = vpop.f32.mrb[1].mxu0 }
 0x1a4   : > { %v532_v36 = vadd.f32 %v531_v35, %v435_v32 }
 0x1a5   : > { %v551_v37 = vmax.f32 %v537_v34, 0.0 }
 0x1a6   : > { %v550_v39 = vmax.f32 %v532_v36, 0.0  ;;  %v746_v40 = vpop.f32.mrb[2].mxu0 }
 0x1a7   : > { %v547_v42 = vadd.f32 %v746_v40, %v450_v38  ;;  %v541_v43 = vpop.f32.mrb[3].mxu0 }
 0x1a8   : > { %v542_v44 = vadd.f32 %v541_v43, %v445_v41  ;;  %v767_v45 = vpack.c.bf16 %v551_v37, %v550_v39 }
 0x1a9   : > { %v553_v46 = vmax.f32 %v547_v42, 0.0 }
 0x1aa   : > { %v552_v47 = vmax.f32 %v542_v44, 0.0  ;;  %768 = vmatpush3.bf16.msra.mxu1 %v767_v45 }
 0x1ab   : > { %769 = vmatprep.subr.bf16.mxu1 %v897_v27 }
 0x1ac   : > { %v770_v48 = vpack.c.bf16 %v553_v46, %v552_v47 }
 0x1ae   : > { %771 = vmatpush3.bf16.msra.mxu1 %v770_v48 }
 0x1b1   : > { %756 = vmatmul.mubr.msk.f32.vlgmr.msra.gmra.mrb[0].mxu1 %vm452_vm0, %v554_v49 }
 0x284   : > { %v634_v52 = vpop.f32.mrb[0].mxu1 }
 0x285   : > { %v635_v53 = vadd.f32 %v634_v52, %v564_v51  ;;  %v757_v54 = vpop.f32.mrb[1].mxu1 }
 0x287   : > { %638 = vst [vmem:[%s270_s25] sm:$0x1] %v635_v53 }
 0x288   : > { %842 = shalt.err (!%p839_p3)
}
 0x289   : > { %s843_s19 = scalar_lea.hbm %s1068_s14, 16  ;;  %s847_s22 = scalar_lea.hbm %s1117_s7, 48 }
 0x28a   : > { %p844_p4 = scmp.ne.s32.totalorder %s1068_s14, %s843_s19  ;;  %p848_p9 = scmp.lt.u32.totalorder %s1068_s14, %s1117_s7 }
 0x28b   : > { %p849_p10 = scmp.lt.u32.totalorder %s847_s22, %s843_s19  ;;  %p851_p12 = scmp.lt.u32.totalorder %s843_s19, %s1068_s14 }
 0x28c   : > { %p845_p7 = pnand %p844_p4, %p982_p5 }
 0x28d   : > { %p850_p11 = por %p849_p10, %p848_p9 }
 0x28e   : > { %p846_p8 = pneg %p845_p7 }
 0x28f   : > { %p852_p13 = por %p851_p12, %p850_p11 }
 0x291   : > { %p853_p0 = pnand %p852_p13, %p846_p8 }
 0x293   : > { %856 = shalt.err (!%p853_p0)
}
 0x294   : > { %772 = dma.vmem_to_hbm [thread:$0]  (%p982_p5), %s1070_s30, 16, %s1068_s14, %s640_s6  }
 0x295 PF: > { %p778_p1 = scmp.ge.s32.totalorder %s891_s29, 2  ;;  %s664_s25 = sand.u32 1, %s879_s26  }
 0x296   : > { %s665_s9 = scalar_lea.sflag [#allocation4], %s664_s25 }
 0x297   : > { %p775_p2 = pnand %p778_p1, %p986_p6 }
 0x299   : > { %874 = dma.done.wait (!%p775_p2), %s665_s9, 16  }
 0x29a   : > { %876 = vsyncadd (!%p775_p2), %s665_s9, 4294967280  ;;  %p19_p3 = scmp.ge.s32.totalorder %s969_s8, 5   ;;  %s1120_s26 = smov %s883_s27 }
 0x29b   : > { %s1121_s27 = smov %s887_s28  ;;  %s1122_s28 = smov %s980_s11 }
 0x29c   : > { %s1123_s29 = smov %s969_s8  ;;  %21 = sbr.rel (!%p19_p3) target bundleno = 6 (0x6), region = 83 }
 0x2a3   :  { %669 = vsyncpa [#allocation4], 1 }
 0x2a4   :  { %671 = vsyncpa [#allocation4 + $0x1], 1 }

</bundles_post_ra>
